<compile_context>
chip_gen: v7x
topology: tpu7x:2x2x1
jax: 0.10.0
libtpu: 0.0.40
codegen_flags: <defaults>
</compile_context>

<pallas_src>
import math

import jax
import jax.numpy as jnp
from jax import lax
from jax.experimental import pallas as pl
from jax.experimental.pallas import tpu as pltpu


def _round_up(x: int, m: int) -> int:
    return (x + m - 1) // m * m


def _make_cross_att_kernel(norm_fact: float, tile_kv: int, n_kv: int, needs_mask: bool):
    """Flash-style cross-attention kernel. Grid = (q_tiles, kv_tiles)."""

    def kernel(q_ref, k_ref, v_ref,
               wq_ref, bq_ref, wk_ref, bk_ref, wv_ref, bv_ref,
               o_ref,
               qproj_ref, m_ref, l_ref, acc_ref):
        j = pl.program_id(1)
        n_j = pl.num_programs(1)

        @pl.when(j == 0)
        def _init():
            # Project this query tile once and cache it; reset online-softmax state.
            qproj_ref[...] = (
                jnp.dot(q_ref[...], wq_ref[...], preferred_element_type=jnp.float32)
                + bq_ref[...]
            )
            m_ref[...] = jnp.full_like(m_ref, -jnp.inf)
            l_ref[...] = jnp.zeros_like(l_ref)
            acc_ref[...] = jnp.zeros_like(acc_ref)

        # Project the current K/V tile.
        K = jnp.dot(k_ref[...], wk_ref[...], preferred_element_type=jnp.float32) + bk_ref[...]
        V = jnp.dot(v_ref[...], wv_ref[...], preferred_element_type=jnp.float32) + bv_ref[...]

        # scores[q, kv] = sum_d Q[q, d] * K[kv, d]  (contract last dims; no K transpose)
        s = lax.dot_general(
            qproj_ref[...], K,
            dimension_numbers=(((1,), (1,)), ((), ())),
            preferred_element_type=jnp.float32,
        )

        if needs_mask:
            # Mask out padded KV token positions (feature padding is zero-safe,
            # token padding is not -> force to -inf before the softmax).
            kv_idx = j * tile_kv + lax.broadcasted_iota(jnp.int32, s.shape, 1)
            s = jnp.where(kv_idx < n_kv, s, -jnp.inf)

        # Online softmax update.
        m_prev = m_ref[...]
        m_new = jnp.maximum(m_prev, jnp.max(s, axis=-1, keepdims=True))
        alpha = jnp.exp(m_prev - m_new)                    # (tile_q, 1)
        p = jnp.exp(s - m_new)                             # (tile_q, tile_kv)
        l_ref[...] = alpha * l_ref[...] + jnp.sum(p, axis=-1, keepdims=True)
        acc_ref[...] = alpha * acc_ref[...] + jnp.dot(
            p, V, preferred_element_type=jnp.float32)
        m_ref[...] = m_new

        @pl.when(j == n_j - 1)
        def _finalize():
            # norm_fact folded into the per-row scale; applied AFTER the softmax,
            # exactly matching the reference op order (softmax(...) * norm_fact) @ V.
            scale = jnp.float32(norm_fact) * pl.reciprocal(l_ref[...], approx=False)
            o_ref[...] = (acc_ref[...] * scale).astype(o_ref.dtype)

    return kernel


def cross_att(q, k, v, wq, bq, wk, bk, wv, bv, dim_k,
              *, block_q: int = 128, block_kv: int = 256,
              vmem_limit_bytes=None):
    """Cross attention matching the PyTorch Cross_Att.forward.

    q:(Nq,D)  k,v:(Nk,D)  wX:(D,dX) pre-transposed nn.Linear weights  bX:(dX,) or (1,dX).
    """
    Nq, D = q.shape
    Nk = k.shape[0]
    assert v.shape[0] == Nk, "k and v must have the same number of tokens"
    dk = wq.shape[1]
    dv = wv.shape[1]
    norm_fact = 1.0 / math.sqrt(dim_k)

    LANE, SUB = 128, 8
    Dp = _round_up(D, LANE)
    dkp = _round_up(dk, LANE)
    dvp = _round_up(dv, LANE)

    tile_q = min(block_q, _round_up(Nq, SUB))
    tile_kv = min(block_kv, _round_up(Nk, SUB))
    Nq_pad = _round_up(Nq, tile_q)
    Nk_pad = _round_up(Nk, tile_kv)

    f32 = jnp.float32
    # Zero-pad feature (lane) dims -> exact; pad token dims (queries sliced, KV masked).
    qp = jnp.zeros((Nq_pad, Dp), f32).at[:Nq, :D].set(q.astype(f32))
    kp = jnp.zeros((Nk_pad, Dp), f32).at[:Nk, :D].set(k.astype(f32))
    vp = jnp.zeros((Nk_pad, Dp), f32).at[:Nk, :D].set(v.astype(f32))
    wqp = jnp.zeros((Dp, dkp), f32).at[:D, :dk].set(wq.astype(f32))
    wkp = jnp.zeros((Dp, dkp), f32).at[:D, :dk].set(wk.astype(f32))
    wvp = jnp.zeros((Dp, dvp), f32).at[:D, :dv].set(wv.astype(f32))
    bqp = jnp.zeros((1, dkp), f32).at[:, :dk].set(jnp.reshape(bq, (1, -1)).astype(f32))
    bkp = jnp.zeros((1, dkp), f32).at[:, :dk].set(jnp.reshape(bk, (1, -1)).astype(f32))
    bvp = jnp.zeros((1, dvp), f32).at[:, :dv].set(jnp.reshape(bv, (1, -1)).astype(f32))

    grid = (Nq_pad // tile_q, Nk_pad // tile_kv)
    needs_mask = Nk_pad != Nk

    kernel = _make_cross_att_kernel(norm_fact, tile_kv, Nk, needs_mask)

    out_pad = pl.pallas_call(
        kernel,
        out_shape=jax.ShapeDtypeStruct((Nq_pad, dvp), f32),
        grid_spec=pltpu.PrefetchScalarGridSpec(
            num_scalar_prefetch=0,
            grid=grid,
            in_specs=[
                pl.BlockSpec((tile_q, Dp), lambda i, j: (i, 0)),   # q tile
                pl.BlockSpec((tile_kv, Dp), lambda i, j: (j, 0)),  # k tile
                pl.BlockSpec((tile_kv, Dp), lambda i, j: (j, 0)),  # v tile
                pl.BlockSpec((Dp, dkp), lambda i, j: (0, 0)),      # wq
                pl.BlockSpec((1, dkp), lambda i, j: (0, 0)),       # bq
                pl.BlockSpec((Dp, dkp), lambda i, j: (0, 0)),      # wk
                pl.BlockSpec((1, dkp), lambda i, j: (0, 0)),       # bk
                pl.BlockSpec((Dp, dvp), lambda i, j: (0, 0)),      # wv
                pl.BlockSpec((1, dvp), lambda i, j: (0, 0)),       # bv
            ],
            out_specs=pl.BlockSpec((tile_q, dvp), lambda i, j: (i, 0)),
            scratch_shapes=[
                pltpu.VMEM((tile_q, dkp), f32),  # cached projected Q tile
                pltpu.VMEM((tile_q, 1), f32),    # running max
                pltpu.VMEM((tile_q, 1), f32),    # running softmax denominator
                pltpu.VMEM((tile_q, dvp), f32),  # output accumulator
            ],
        ),
        compiler_params=pltpu.CompilerParams(
            dimension_semantics=("parallel", "arbitrary"),
            vmem_limit_bytes=vmem_limit_bytes,
        ),
    )(qp, kp, vp, wqp, bqp, wkp, bkp, wvp, bvp)

    return out_pad[:Nq, :dv]


def cross_att_ref(q, k, v, wq, bq, wk, bk, wv, bv, dim_k):
    Q = q @ wq + jnp.reshape(bq, (1, -1))
    K = k @ wk + jnp.reshape(bk, (1, -1))
    V = v @ wv + jnp.reshape(bv, (1, -1))
    s = Q @ K.T
    atten = jax.nn.softmax(s, axis=-1) * (1.0 / math.sqrt(dim_k))
    return atten @ V


def _make_inputs(key, Nq, Nk, input_dim, dim_k, dim_v):
    kq, kk, kv, kwq, kbq, kwk, kbk, kwv, kbv = jax.random.split(key, 9)
    q = jax.random.normal(kq, (Nq, input_dim), jnp.float32)
    k = jax.random.normal(kk, (Nk, input_dim), jnp.float32)
    v = jax.random.normal(kv, (Nk, input_dim), jnp.float32)
    # nn.Linear init range; weights stored pre-transposed as (in, out), bias (1, out).
    s_in = 1.0 / math.sqrt(input_dim)
    wq = jax.random.uniform(kwq, (input_dim, dim_k), jnp.float32, -s_in, s_in)
    bq = jax.random.uniform(kbq, (1, dim_k), jnp.float32, -s_in, s_in)
    wk = jax.random.uniform(kwk, (input_dim, dim_k), jnp.float32, -s_in, s_in)
    bk = jax.random.uniform(kbk, (1, dim_k), jnp.float32, -s_in, s_in)
    wv = jax.random.uniform(kwv, (input_dim, dim_v), jnp.float32, -s_in, s_in)
    bv = jax.random.uniform(kbv, (1, dim_v), jnp.float32, -s_in, s_in)
    return q, k, v, wq, bq, wk, bk, wv, bv


if __name__ == "__main__":
    root = jax.random.PRNGKey(0)

    # Case 1: small shapes consistent with the module (seq=8, hidden=32, dk=dv=16).
    Nq, Nk, input_dim, dim_k, dim_v = 8, 8, 32, 16, 16
    args = _make_inputs(jax.random.fold_in(root, 0), Nq, Nk, input_dim, dim_k, dim_v)
    out = cross_att(*args, dim_k)
    out = jax.block_until_ready(out)
    ref = cross_att_ref(*args, dim_k)
    assert out.shape == (Nq, dim_v)
    assert jnp.allclose(out, ref, atol=2e-5, rtol=2e-5), "case 1: mismatch vs reference"

    # Case 2: ragged shapes + small tiles to exercise the multi-tile flash grid,
    # token padding / KV masking, and the online-softmax accumulator.
    Nq, Nk, input_dim, dim_k, dim_v = 40, 56, 48, 24, 40
    args = _make_inputs(jax.random.fold_in(root, 1), Nq, Nk, input_dim, dim_k, dim_v)
    out = cross_att(*args, dim_k, block_q=16, block_kv=16)
    out = jax.block_until_ready(out)
    ref = cross_att_ref(*args, dim_k)
    assert out.shape == (Nq, dim_v)
    assert jnp.allclose(out, ref, atol=2e-5, rtol=2e-5), "case 2: mismatch vs reference"

    print("KERNEL_OK")
</pallas_src>

<mosaic_0001>
module attributes {stable_mosaic.version = 11 : i64} {
  func.func @kernel(%arg0: i32, %arg1: i32, %arg2: memref<8x128xf32, #tpu.memory_space<vmem>>, %arg3: memref<8x128xf32, #tpu.memory_space<vmem>>, %arg4: memref<8x128xf32, #tpu.memory_space<vmem>>, %arg5: memref<128x128xf32, #tpu.memory_space<vmem>>, %arg6: memref<1x128xf32, #tpu.memory_space<vmem>>, %arg7: memref<128x128xf32, #tpu.memory_space<vmem>>, %arg8: memref<1x128xf32, #tpu.memory_space<vmem>>, %arg9: memref<128x128xf32, #tpu.memory_space<vmem>>, %arg10: memref<1x128xf32, #tpu.memory_space<vmem>>, %arg11: memref<8x128xf32, #tpu.memory_space<vmem>>, %arg12: memref<8x128xf32, #tpu.memory_space<vmem>>, %arg13: memref<8x1xf32, #tpu.memory_space<vmem>>, %arg14: memref<8x1xf32, #tpu.memory_space<vmem>>, %arg15: memref<8x128xf32, #tpu.memory_space<vmem>>) attributes {dimension_semantics = [#tpu.dimension_semantics<parallel>, #tpu.dimension_semantics<arbitrary>], iteration_bounds = array<i64: 1, 1>, scalar_prefetch = 0 : i64, scratch_operands = 4 : i64, tpu.core_type = #tpu.core_type<tc>, window_params = [{transform_indices = @transform_0, window_bounds = array<i64: 8, 128>}, {transform_indices = @transform_1, window_bounds = array<i64: 8, 128>}, {transform_indices = @transform_2, window_bounds = array<i64: 8, 128>}, {pipeline_mode = #tpu.pipeline_mode<synchronous>, transform_indices = @transform_3, window_bounds = array<i64: 128, 128>}, {pipeline_mode = #tpu.pipeline_mode<synchronous>, transform_indices = @transform_4, window_bounds = array<i64: 1, 128>}, {pipeline_mode = #tpu.pipeline_mode<synchronous>, transform_indices = @transform_5, window_bounds = array<i64: 128, 128>}, {pipeline_mode = #tpu.pipeline_mode<synchronous>, transform_indices = @transform_6, window_bounds = array<i64: 1, 128>}, {pipeline_mode = #tpu.pipeline_mode<synchronous>, transform_indices = @transform_7, window_bounds = array<i64: 128, 128>}, {pipeline_mode = #tpu.pipeline_mode<synchronous>, transform_indices = @transform_8, window_bounds = array<i64: 1, 128>}, {transform_indices = @transform_9, window_bounds = array<i64: 8, 128>}]} {
    %c0_i32 = arith.constant 0 : i32
    %0 = arith.cmpi eq, %arg1, %c0_i32 : i32
    %1 = arith.extui %0 : i1 to i32
    %c0_i32_0 = arith.constant 0 : i32
    %2 = arith.cmpi ne, %1, %c0_i32_0 : i32
    scf.if %2 {
      %c0_33 = arith.constant 0 : index
      %c0_34 = arith.constant 0 : index
      %42 = vector.load %arg2[%c0_33, %c0_34] : memref<8x128xf32, #tpu.memory_space<vmem>>, vector<8x128xf32>
      %c0_35 = arith.constant 0 : index
      %c0_36 = arith.constant 0 : index
      %43 = vector.load %arg5[%c0_35, %c0_36] : memref<128x128xf32, #tpu.memory_space<vmem>>, vector<128x128xf32>
      %cst_37 = arith.constant dense<0.000000e+00> : vector<8x128xf32>
      %44 = tpu.matmul %42, %43, %cst_37 {dimension_numbers = #tpu.dot_dimension_numbers<[1], [0], [0], [1], [0, 0, 1, 1], [], []>} : vector<8x128xf32>, vector<128x128xf32>, vector<8x128xf32> -> vector<8x128xf32>
      %c0_38 = arith.constant 0 : index
      %c0_39 = arith.constant 0 : index
      %45 = vector.load %arg6[%c0_38, %c0_39] : memref<1x128xf32, #tpu.memory_space<vmem>>, vector<1x128xf32>
      %46 = vector.broadcast %45 : vector<1x128xf32> to vector<8x128xf32>
      %47 = arith.addf %44, %46 : vector<8x128xf32>
      %c0_40 = arith.constant 0 : index
      %c0_41 = arith.constant 0 : index
      %48 = vector.load %arg12[%c0_40, %c0_41] : memref<8x128xf32, #tpu.memory_space<vmem>>, vector<8x128xf32>
      tpu.vector_store %arg12[%c0_40, %c0_41], %47 {strides = array<i32>} : memref<8x128xf32, #tpu.memory_space<vmem>>, vector<8x128xf32>,
      %cst_42 = arith.constant 0xFF800000 : f32
      %49 = vector.broadcast %cst_42 : f32 to vector<8x1xf32>
      %c0_43 = arith.constant 0 : index
      %c0_44 = arith.constant 0 : index
      %50 = vector.load %arg13[%c0_43, %c0_44] : memref<8x1xf32, #tpu.memory_space<vmem>>, vector<8x1xf32>
      tpu.vector_store %arg13[%c0_43, %c0_44], %49 {strides = array<i32>} : memref<8x1xf32, #tpu.memory_space<vmem>>, vector<8x1xf32>,
      %cst_45 = arith.constant 0.000000e+00 : f32
      %51 = vector.broadcast %cst_45 : f32 to vector<8x1xf32>
      %c0_46 = arith.constant 0 : index
      %c0_47 = arith.constant 0 : index
      %52 = vector.load %arg14[%c0_46, %c0_47] : memref<8x1xf32, #tpu.memory_space<vmem>>, vector<8x1xf32>
      tpu.vector_store %arg14[%c0_46, %c0_47], %51 {strides = array<i32>} : memref<8x1xf32, #tpu.memory_space<vmem>>, vector<8x1xf32>,
      %cst_48 = arith.constant 0.000000e+00 : f32
      %53 = vector.broadcast %cst_48 : f32 to vector<8x128xf32>
      %c0_49 = arith.constant 0 : index
      %c0_50 = arith.constant 0 : index
      %54 = vector.load %arg15[%c0_49, %c0_50] : memref<8x128xf32, #tpu.memory_space<vmem>>, vector<8x128xf32>
      tpu.vector_store %arg15[%c0_49, %c0_50], %53 {strides = array<i32>} : memref<8x128xf32, #tpu.memory_space<vmem>>, vector<8x128xf32>,
    } else {
    }
    %c0 = arith.constant 0 : index
    %c0_1 = arith.constant 0 : index
    %3 = vector.load %arg3[%c0, %c0_1] : memref<8x128xf32, #tpu.memory_space<vmem>>, vector<8x128xf32>
    %c0_2 = arith.constant 0 : index
    %c0_3 = arith.constant 0 : index
    %4 = vector.load %arg7[%c0_2, %c0_3] : memref<128x128xf32, #tpu.memory_space<vmem>>, vector<128x128xf32>
    %cst = arith.constant dense<0.000000e+00> : vector<8x128xf32>
    %5 = tpu.matmul %3, %4, %cst {dimension_numbers = #tpu.dot_dimension_numbers<[1], [0], [0], [1], [0, 0, 1, 1], [], []>} : vector<8x128xf32>, vector<128x128xf32>, vector<8x128xf32> -> vector<8x128xf32>
    %c0_4 = arith.constant 0 : index
    %c0_5 = arith.constant 0 : index
    %6 = vector.load %arg8[%c0_4, %c0_5] : memref<1x128xf32, #tpu.memory_space<vmem>>, vector<1x128xf32>
    %7 = vector.broadcast %6 : vector<1x128xf32> to vector<8x128xf32>
    %8 = arith.addf %5, %7 : vector<8x128xf32>
    %c0_6 = arith.constant 0 : index
    %c0_7 = arith.constant 0 : index
    %9 = vector.load %arg4[%c0_6, %c0_7] : memref<8x128xf32, #tpu.memory_space<vmem>>, vector<8x128xf32>
    %c0_8 = arith.constant 0 : index
    %c0_9 = arith.constant 0 : index
    %10 = vector.load %arg9[%c0_8, %c0_9] : memref<128x128xf32, #tpu.memory_space<vmem>>, vector<128x128xf32>
    %cst_10 = arith.constant dense<0.000000e+00> : vector<8x128xf32>
    %11 = tpu.matmul %9, %10, %cst_10 {dimension_numbers = #tpu.dot_dimension_numbers<[1], [0], [0], [1], [0, 0, 1, 1], [], []>} : vector<8x128xf32>, vector<128x128xf32>, vector<8x128xf32> -> vector<8x128xf32>
    %c0_11 = arith.constant 0 : index
    %c0_12 = arith.constant 0 : index
    %12 = vector.load %arg10[%c0_11, %c0_12] : memref<1x128xf32, #tpu.memory_space<vmem>>, vector<1x128xf32>
    %13 = vector.broadcast %12 : vector<1x128xf32> to vector<8x128xf32>
    %14 = arith.addf %11, %13 : vector<8x128xf32>
    %c0_13 = arith.constant 0 : index
    %c0_14 = arith.constant 0 : index
    %15 = vector.load %arg12[%c0_13, %c0_14] : memref<8x128xf32, #tpu.memory_space<vmem>>, vector<8x128xf32>
    %cst_15 = arith.constant dense<0.000000e+00> : vector<8x8xf32>
    %16 = tpu.matmul %15, %8, %cst_15 {dimension_numbers = #tpu.dot_dimension_numbers<[1], [1], [0], [0], [0, 0, 1, 0], [], []>} : vector<8x128xf32>, vector<8x128xf32>, vector<8x8xf32> -> vector<8x8xf32>
    %c0_16 = arith.constant 0 : index
    %c0_17 = arith.constant 0 : index
    %17 = vector.load %arg13[%c0_16, %c0_17] : memref<8x1xf32, #tpu.memory_space<vmem>>, vector<8x1xf32>
    %cst_18 = arith.constant dense<0xFF800000> : vector<8xf32>
    %18 = vector.multi_reduction <maximumf>, %16, %cst_18 [1] : vector<8x8xf32> to vector<8xf32>
    %19 = vector.shape_cast %18 : vector<8xf32> to vector<8x1xf32>
    %20 = arith.maximumf %17, %19 : vector<8x1xf32>
    %21 = arith.subf %17, %20 : vector<8x1xf32>
    %22 = math.exp %21 : vector<8x1xf32>
    %23 = vector.broadcast %20 : vector<8x1xf32> to vector<8x8xf32>
    %24 = arith.subf %16, %23 : vector<8x8xf32>
    %25 = math.exp %24 : vector<8x8xf32>
    %c0_19 = arith.constant 0 : index
    %c0_20 = arith.constant 0 : index
    %26 = vector.load %arg14[%c0_19, %c0_20] : memref<8x1xf32, #tpu.memory_space<vmem>>, vector<8x1xf32>
    %27 = arith.mulf %22, %26 : vector<8x1xf32>
    %cst_21 = arith.constant dense<0.000000e+00> : vector<8xf32>
    %28 = vector.multi_reduction <add>, %25, %cst_21 [1] : vector<8x8xf32> to vector<8xf32>
    %29 = vector.shape_cast %28 : vector<8xf32> to vector<8x1xf32>
    %30 = arith.addf %27, %29 : vector<8x1xf32>
    %c0_22 = arith.constant 0 : index
    %c0_23 = arith.constant 0 : index
    %31 = vector.load %arg14[%c0_22, %c0_23] : memref<8x1xf32, #tpu.memory_space<vmem>>, vector<8x1xf32>
    tpu.vector_store %arg14[%c0_22, %c0_23], %30 {strides = array<i32>} : memref<8x1xf32, #tpu.memory_space<vmem>>, vector<8x1xf32>,
    %c0_24 = arith.constant 0 : index
    %c0_25 = arith.constant 0 : index
    %32 = vector.load %arg15[%c0_24, %c0_25] : memref<8x128xf32, #tpu.memory_space<vmem>>, vector<8x128xf32>
    %33 = vector.broadcast %22 : vector<8x1xf32> to vector<8x128xf32>
    %34 = arith.mulf %33, %32 : vector<8x128xf32>
    %cst_26 = arith.constant dense<0.000000e+00> : vector<8x128xf32>
    %35 = tpu.matmul %25, %14, %cst_26 {dimension_numbers = #tpu.dot_dimension_numbers<[1], [0], [0], [1], [0, 0, 1, 1], [], []>} : vector<8x8xf32>, vector<8x128xf32>, vector<8x128xf32> -> vector<8x128xf32>
    %36 = arith.addf %34, %35 : vector<8x128xf32>
    %c0_27 = arith.constant 0 : index
    %c0_28 = arith.constant 0 : index
    %37 = vector.load %arg15[%c0_27, %c0_28] : memref<8x128xf32, #tpu.memory_space<vmem>>, vector<8x128xf32>
    tpu.vector_store %arg15[%c0_27, %c0_28], %36 {strides = array<i32>} : memref<8x128xf32, #tpu.memory_space<vmem>>, vector<8x128xf32>,
    %c0_29 = arith.constant 0 : index
    %c0_30 = arith.constant 0 : index
    %38 = vector.load %arg13[%c0_29, %c0_30] : memref<8x1xf32, #tpu.memory_space<vmem>>, vector<8x1xf32>
    tpu.vector_store %arg13[%c0_29, %c0_30], %20 {strides = array<i32>} : memref<8x1xf32, #tpu.memory_space<vmem>>, vector<8x1xf32>,
    %c0_i32_31 = arith.constant 0 : i32
    %39 = arith.cmpi eq, %arg1, %c0_i32_31 : i32
    %40 = arith.extui %39 : i1 to i32
    %c0_i32_32 = arith.constant 0 : i32
    %41 = arith.cmpi ne, %40, %c0_i32_32 : i32
    scf.if %41 {
      %c0_33 = arith.constant 0 : index
      %c0_34 = arith.constant 0 : index
      %42 = vector.load %arg14[%c0_33, %c0_34] : memref<8x1xf32, #tpu.memory_space<vmem>>, vector<8x1xf32>
      %43 = tpu.reciprocal %42 : vector<8x1xf32> -> vector<8x1xf32>
      %cst_35 = arith.constant 2.500000e-01 : f32
      %44 = vector.broadcast %cst_35 : f32 to vector<8x1xf32>
      %45 = arith.mulf %44, %43 : vector<8x1xf32>
      %c0_36 = arith.constant 0 : index
      %c0_37 = arith.constant 0 : index
      %46 = vector.load %arg15[%c0_36, %c0_37] : memref<8x128xf32, #tpu.memory_space<vmem>>, vector<8x128xf32>
      %47 = vector.broadcast %45 : vector<8x1xf32> to vector<8x128xf32>
      %48 = arith.mulf %46, %47 : vector<8x128xf32>
      %c0_38 = arith.constant 0 : index
      %c0_39 = arith.constant 0 : index
      %49 = vector.load %arg11[%c0_38, %c0_39] : memref<8x128xf32, #tpu.memory_space<vmem>>, vector<8x128xf32>
      tpu.vector_store %arg11[%c0_38, %c0_39], %48 {strides = array<i32>} : memref<8x128xf32, #tpu.memory_space<vmem>>, vector<8x128xf32>,
    } else {
    }
    return
  }
  func.func @transform_0(%arg0: i32, %arg1: i32) -> (i32, i32) {
    %c0_i32 = arith.constant 0 : i32
    %c0_i32_0 = arith.constant 0 : i32
    return %arg0, %c0_i32 : i32, i32
  }
  func.func @transform_1(%arg0: i32, %arg1: i32) -> (i32, i32) {
    %c0_i32 = arith.constant 0 : i32
    %c0_i32_0 = arith.constant 0 : i32
    return %arg1, %c0_i32 : i32, i32
  }
  func.func @transform_2(%arg0: i32, %arg1: i32) -> (i32, i32) {
    %c0_i32 = arith.constant 0 : i32
    %c0_i32_0 = arith.constant 0 : i32
    return %arg1, %c0_i32 : i32, i32
  }
  func.func @transform_3(%arg0: i32, %arg1: i32) -> (i32, i32) {
    %c0_i32 = arith.constant 0 : i32
    %c0_i32_0 = arith.constant 0 : i32
    %c0_i32_1 = arith.constant 0 : i32
    return %c0_i32, %c0_i32_0 : i32, i32
  }
  func.func @transform_4(%arg0: i32, %arg1: i32) -> (i32, i32) {
    %c0_i32 = arith.constant 0 : i32
    %c0_i32_0 = arith.constant 0 : i32
    %c0_i32_1 = arith.constant 0 : i32
    return %c0_i32, %c0_i32_0 : i32, i32
  }
  func.func @transform_5(%arg0: i32, %arg1: i32) -> (i32, i32) {
    %c0_i32 = arith.constant 0 : i32
    %c0_i32_0 = arith.constant 0 : i32
    %c0_i32_1 = arith.constant 0 : i32
    return %c0_i32, %c0_i32_0 : i32, i32
  }
  func.func @transform_6(%arg0: i32, %arg1: i32) -> (i32, i32) {
    %c0_i32 = arith.constant 0 : i32
    %c0_i32_0 = arith.constant 0 : i32
    %c0_i32_1 = arith.constant 0 : i32
    return %c0_i32, %c0_i32_0 : i32, i32
  }
  func.func @transform_7(%arg0: i32, %arg1: i32) -> (i32, i32) {
    %c0_i32 = arith.constant 0 : i32
    %c0_i32_0 = arith.constant 0 : i32
    %c0_i32_1 = arith.constant 0 : i32
    return %c0_i32, %c0_i32_0 : i32, i32
  }
  func.func @transform_8(%arg0: i32, %arg1: i32) -> (i32, i32) {
    %c0_i32 = arith.constant 0 : i32
    %c0_i32_0 = arith.constant 0 : i32
    %c0_i32_1 = arith.constant 0 : i32
    return %c0_i32, %c0_i32_0 : i32, i32
  }
  func.func @transform_9(%arg0: i32, %arg1: i32) -> (i32, i32) {
    %c0_i32 = arith.constant 0 : i32
    %c0_i32_0 = arith.constant 0 : i32
    return %arg0, %c0_i32 : i32, i32
  }
}

</mosaic_0001>

<bundles_post_ra>
// kernel: tpu_custom_call.1
= control target key start
LH: loop header
LB: loop body
LE: loop exit
PB: predicated region body
PF: predicated region fallthrough
CT: control target
= control target key end

     0   :  { %14 = vsyncpa [#allocation7], 0  ;;  %s1267_s0 = inlined_call_operand.hbm [shape: f32[8,128], index: 0, kind: input, shape index: {}]   ;;  %s1268_s1 = inlined_call_operand.hbm [shape: f32[8,128], index: 1, kind: input, shape index: {}]   ;;  %s1269_s2 = inlined_call_operand.hbm [shape: f32[8,128], index: 2, kind: input, shape index: {}]   ;;  %s1270_s3 = inlined_call_operand.hbm [shape: f32[128,128], index: 3, kind: input, shape index: {}]   ;;  %s1271_s4 = inlined_call_operand.vmem [shape: f32[1,128], index: 4, kind: input, shape index: {}]   ;;  %s1272_s5 = inlined_call_operand.hbm [shape: f32[128,128], index: 5, kind: input, shape index: {}]   ;;  %s1273_s6 = inlined_call_operand.vmem [shape: f32[1,128], index: 6, kind: input, shape index: {}]   ;;  %s1274_s7 = inlined_call_operand.hbm [shape: f32[128,128], index: 7, kind: input, shape index: {}]   ;;  %s1275_s8 = inlined_call_operand.vmem [shape: f32[1,128], index: 8, kind: input, shape index: {}]   ;;  %s1276_s9 = inlined_call_operand.hbm [shape: f32[8,128], index: 9, kind: output, shape index: {}]  }
   0x1   :  { %15 = vsyncpa [#allocation10], 0 }
   0x2   :  { %16 = vsyncpa [#allocation13], 0 }
   0x3   :  { %17 = vsyncpa [#allocation16], 0 }
   0x4   :  { %18 = vsyncpa [#allocation8], 0  ;;  %s1043_s30 = smov [#allocation9]   ;;  %s1044_s11 = smov [#allocation12]  }
   0x5   :  { %s35_s10 = sshll.u32 %s1043_s30, 4  ;;  %s54_s12 = sshll.u32 %s1044_s11, 4  ;;  %s36_s10 = int_to_ptr.vmem [resolvable:$true] %s35_s10  ;;  %s1107_s12 = int_to_ptr.vmem [resolvable:$true] %s54_s12 }
   0x6   :  { %s879_s15 = scalar_lea.hbm %s1268_s1, 128 }
   0x7   :  { %p880_p0 = scmp.ne.s32.totalorder %s1268_s1, %s879_s15  ;;  %p883_p1 = scmp.lt.u32.totalorder %s879_s15, %s1268_s1 }
   0x9   :  { %p885_p2 = pnand %p883_p1, %p880_p0 }
   0xb   :  { %888 = shalt.err (!%p885_p2)
}
   0xc   :  { %s889_s20 = scalar_lea.vmem %s36_s10, 128  ;;  %p894_p4 = scmp.lt.s32.totalorder %s36_s10, %s36_s10 }
   0xd   :  { %p890_p3 = scmp.ne.s32.totalorder %s36_s10, %s889_s20  ;;  %p895_p5 = scmp.lt.s32.totalorder %s889_s20, %s889_s20 }
   0xf   :  { %p896_p6 = por %p895_p5, %p894_p4 }
  0x11   :  { %p897_p7 = pnand %p896_p6, %p890_p3 }
  0x13   :  { %900 = shalt.err (!%p897_p7)
}
  0x14   :  { %38 = dma.hbm_to_vmem [thread:$0]  %s1268_s1, 128, %s36_s10, [#allocation10]  }
  0x15   :  { %s901_s25 = scalar_lea.hbm %s1270_s3, 2048 }
  0x16   :  { %p902_p8 = scmp.ne.s32.totalorder %s1270_s3, %s901_s25  ;;  %p905_p9 = scmp.lt.u32.totalorder %s901_s25, %s1270_s3 }
  0x18   :  { %p907_p10 = pnand %p905_p9, %p902_p8 }
  0x1a   :  { %910 = shalt.err (!%p907_p10)
}
  0x1b   :  { %s911_s30 = scalar_lea.vmem %s1107_s12, 2048  ;;  %p916_p12 = scmp.lt.s32.totalorder %s1107_s12, %s1107_s12 }
  0x1c   :  { %p912_p11 = scmp.ne.s32.totalorder %s1107_s12, %s911_s30  ;;  %p917_p13 = scmp.lt.s32.totalorder %s911_s30, %s911_s30 }
  0x1e   :  { %p918_p0 = por %p917_p13, %p916_p12 }
  0x20   :  { %p919_p1 = pnand %p918_p0, %p912_p11 }
  0x22   :  { %922 = shalt.err (!%p919_p1)
}
  0x23   :  { %s1045_s1 = smov 128   ;;  %s1046_s10 = smov 8  }
  0x24   :  { %60 = dma.hbm_to_vmem [thread:$0]  %s1270_s3, 2048, %s1107_s12, [#allocation13], %s1045_s1, %s1045_s1, %s1046_s10  }
  0x25   :  { %s1047_s14 = smov [#allocation6]   ;;  %s1048_s16 = smov [#allocation11]  }
  0x26   :  { %s25_s15 = sshll.u32 %s1047_s14, 4  ;;  %s45_s17 = sshll.u32 %s1048_s16, 4  ;;  %s26_s15 = int_to_ptr.vmem [resolvable:$true] %s25_s15  ;;  %s46_s17 = int_to_ptr.vmem [resolvable:$true] %s45_s17 }
  0x27   :  { %s923_s20 = scalar_lea.hbm %s1267_s0, 128 }
  0x28   :  { %p924_p2 = scmp.ne.s32.totalorder %s1267_s0, %s923_s20  ;;  %p927_p3 = scmp.lt.u32.totalorder %s923_s20, %s1267_s0 }
  0x2a   :  { %p929_p4 = pnand %p927_p3, %p924_p2 }
  0x2c   :  { %932 = shalt.err (!%p929_p4)
}
  0x2d   :  { %s933_s3 = scalar_lea.vmem %s26_s15, 128  ;;  %p938_p6 = scmp.lt.s32.totalorder %s26_s15, %s26_s15 }
  0x2e   :  { %p934_p5 = scmp.ne.s32.totalorder %s26_s15, %s933_s3  ;;  %p939_p7 = scmp.lt.s32.totalorder %s933_s3, %s933_s3 }
  0x30   :  { %p940_p8 = por %p939_p7, %p938_p6 }
  0x32   :  { %p941_p9 = pnand %p940_p8, %p934_p5 }
  0x34   :  { %944 = shalt.err (!%p941_p9)
}
  0x35   :  { %28 = dma.hbm_to_vmem [thread:$0]  %s1267_s0, 128, %s26_s15, [#allocation7]  }
  0x36   :  { %s945_s28 = scalar_lea.hbm %s1269_s2, 128 }
  0x37   :  { %p946_p10 = scmp.ne.s32.totalorder %s1269_s2, %s945_s28  ;;  %p949_p11 = scmp.lt.u32.totalorder %s945_s28, %s1269_s2 }
  0x39   :  { %p951_p12 = pnand %p949_p11, %p946_p10 }
  0x3b   :  { %954 = shalt.err (!%p951_p12)
}
  0x3c   :  { %s955_s14 = scalar_lea.vmem %s46_s17, 128  ;;  %p960_p0 = scmp.lt.s32.totalorder %s46_s17, %s46_s17 }
  0x3d   :  { %p956_p13 = scmp.ne.s32.totalorder %s46_s17, %s955_s14  ;;  %p961_p1 = scmp.lt.s32.totalorder %s955_s14, %s955_s14 }
  0x3f   :  { %p962_p2 = por %p961_p1, %p960_p0 }
  0x41   :  { %p963_p3 = pnand %p962_p2, %p956_p13 }
  0x43   :  { %966 = shalt.err (!%p963_p3)
}
  0x44   :  { %48 = dma.hbm_to_vmem [thread:$0]  %s1269_s2, 128, %s46_s17, [#allocation10]  }
  0x45   :  { %s1049_s16 = smov [#allocation14]   ;;  %s1050_s19 = smov [#allocation15]  }
  0x46   :  { %s68_s18 = sshll.u32 %s1049_s16, 4  ;;  %s82_s20 = sshll.u32 %s1050_s19, 4  ;;  %s69_s18 = int_to_ptr.vmem [resolvable:$true] %s68_s18  ;;  %s1165_s20 = int_to_ptr.vmem [resolvable:$true] %s82_s20 }
  0x47   :  { %s967_s23 = scalar_lea.hbm %s1272_s5, 2048 }
  0x48   :  { %p968_p4 = scmp.ne.s32.totalorder %s1272_s5, %s967_s23  ;;  %p971_p5 = scmp.lt.u32.totalorder %s967_s23, %s1272_s5 }
  0x4a   :  { %p973_p6 = pnand %p971_p5, %p968_p4 }
  0x4c   :  { %976 = shalt.err (!%p973_p6)
}
  0x4d   :  { %s977_s2 = scalar_lea.vmem %s69_s18, 2048  ;;  %p982_p8 = scmp.lt.s32.totalorder %s69_s18, %s69_s18 }
  0x4e   :  { %p978_p7 = scmp.ne.s32.totalorder %s69_s18, %s977_s2  ;;  %p983_p9 = scmp.lt.s32.totalorder %s977_s2, %s977_s2 }
  0x50   :  { %p984_p10 = por %p983_p9, %p982_p8 }
  0x52   :  { %p985_p11 = pnand %p984_p10, %p978_p7 }
  0x54   :  { %988 = shalt.err (!%p985_p11)
}
  0x55   :  { %74 = dma.hbm_to_vmem [thread:$0]  %s1272_s5, 2048, %s69_s18, [#allocation13], %s1045_s1, %s1045_s1, %s1046_s10  }
  0x56   :  { %s989_s29 = scalar_lea.hbm %s1274_s7, 2048 }
  0x57   :  { %p990_p12 = scmp.ne.s32.totalorder %s1274_s7, %s989_s29  ;;  %p993_p13 = scmp.lt.u32.totalorder %s989_s29, %s1274_s7 }
  0x59   :  { %p995_p0 = pnand %p993_p13, %p990_p12 }
  0x5b   :  { %998 = shalt.err (!%p995_p0)
}
  0x5c   :  { %s999_s0 = scalar_lea.vmem %s1165_s20, 2048  ;;  %p1004_p2 = scmp.lt.s32.totalorder %s1165_s20, %s1165_s20 }
  0x5d   :  { %p1000_p1 = scmp.ne.s32.totalorder %s1165_s20, %s999_s0  ;;  %p1005_p3 = scmp.lt.s32.totalorder %s999_s0, %s999_s0 }
  0x5f   :  { %p1006_p4 = por %p1005_p3, %p1004_p2 }
  0x61   :  { %p1007_p5 = pnand %p1006_p4, %p1000_p1 }
  0x63   :  { %1010 = shalt.err (!%p1007_p5)
}
  0x64   :  { %88 = dma.hbm_to_vmem [thread:$0]  %s1274_s7, 2048, %s1165_s20, [#allocation16], %s1045_s1, %s1045_s1, %s1046_s10  }
  0x65   :  { %1033 = dma.done.wait [#allocation7], 128  }
  0x66   :  { %1034 = vsyncadd [#allocation7], 4294967168 }
  0x67   :  { %1035 = dma.done.wait [#allocation10], 256  }
  0x68   :  { %1036 = vsyncadd [#allocation10], 4294967040 }
  0x69   :  { %1037 = dma.done.wait [#allocation13], 4096  }
  0x6a   :  { %1038 = vsyncadd [#allocation13], 4294963200 }
  0x6b   :  { %1039 = dma.done.wait [#allocation16], 2048  }
  0x6c   :  { %1040 = vsyncadd [#allocation16], 4294965248  ;;  %v1051_v0 = vmov 0.0|0.0   ;;  %vm1052_vm0 = vmmov 0   ;;  %v1053_v1 = vmov 0.0   ;;  %v213_v2 = vld [vmem:[#allocation14] sm:$0xff] }
  0x6d   :  { %809 = vmatprep.subr.bf16.mxu1 %v1051_v0  ;;  %785 = vmatprep.subr.bf16.mxu0 %v1051_v0  ;;  %v214_v3 = vld [vmem:[#allocation14 + $0x8] sm:$0xff]  ;;  %v114_v4 = vld [vmem:[#allocation12] sm:$0xff]  ;;  %v215_v7 = vld [vmem:[#allocation14 + $0x10] sm:$0xff]  ;;  %vm208_vm1 = vcmask 7168   ;;  %vm472_vm2 = vcmask 64512  }
  0x6e   :  { %737 = vmatprep.mubr.msk.f32.mxu1 %vm1052_vm0, %v1053_v1  ;;  %702 = vmatprep.mubr.msk.f32.mxu0 %vm1052_vm0, %v1053_v1  ;;  %v810_v5 = vpack.c.bf16 %v214_v3, %v213_v2  ;;  %v115_v6 = vld [vmem:[#allocation12 + $0x8] sm:$0xff]  ;;  %v216_v8 = vld [vmem:[#allocation14 + $0x18] sm:$0xff]  ;;  %v116_v10 = vld [vmem:[#allocation12 + $0x10] sm:$0xff]  ;;  %v1054_v3 = vmov -inf   ;;  %210 = vst.msk [vmem:[#allocation4] sm:$0xff] %vm208_vm1, %v1053_v1 }
  0x6f   :  { %v786_v9 = vpack.c.bf16 %v115_v6, %v114_v4  ;;  %v117_v11 = vld [vmem:[#allocation12 + $0x18] sm:$0xff]  ;;  %v813_v12 = vpack.c.bf16 %v216_v8, %v215_v7  ;;  %v217_v14 = vld [vmem:[#allocation14 + $0x20] sm:$0xff]  ;;  %v218_v15 = vld [vmem:[#allocation14 + $0x28] sm:$0xff]  ;;  %209 = vst.msk [vmem:[#allocation3] sm:$0xff] %vm208_vm1, %v1054_v3 }
  0x70   :  { %811 = vmatpush3.bf16.msra.mxu1 %v810_v5  ;;  %v789_v13 = vpack.c.bf16 %v117_v11, %v116_v10  ;;  %v118_v16 = vld [vmem:[#allocation12 + $0x20] sm:$0xff]  ;;  %v119_v17 = vld [vmem:[#allocation12 + $0x28] sm:$0xff]  ;;  %v816_v18 = vpack.c.bf16 %v218_v15, %v217_v14  ;;  %v219_v20 = vld [vmem:[#allocation14 + $0x30] sm:$0xff] }
  0x71   :  { %787 = vmatpush3.bf16.msra.mxu0 %v786_v9  ;;  %812 = vmatprep.subr.bf16.mxu1 %v1051_v0  ;;  %v792_v19 = vpack.c.bf16 %v119_v17, %v118_v16  ;;  %v220_v21 = vld [vmem:[#allocation14 + $0x38] sm:$0xff]  ;;  %v120_v22 = vld [vmem:[#allocation12 + $0x30] sm:$0xff]  ;;  %v221_v26 = vld [vmem:[#allocation14 + $0x40] sm:$0xff] }
  0x72   :  { %788 = vmatprep.subr.bf16.mxu0 %v1051_v0  ;;  %v121_v23 = vld [vmem:[#allocation12 + $0x38] sm:$0xff]  ;;  %v819_v24 = vpack.c.bf16 %v220_v21, %v219_v20  ;;  %v222_v27 = vld [vmem:[#allocation14 + $0x48] sm:$0xff]  ;;  %v122_v28 = vld [vmem:[#allocation12 + $0x40] sm:$0xff] }
  0x73   :  { %v795_v25 = vpack.c.bf16 %v121_v23, %v120_v22  ;;  %v123_v29 = vld [vmem:[#allocation12 + $0x48] sm:$0xff]  ;;  %v822_v30 = vpack.c.bf16 %v222_v27, %v221_v26  ;;  %v223_v32 = vld [vmem:[#allocation14 + $0x50] sm:$0xff]  ;;  %v224_v33 = vld [vmem:[#allocation14 + $0x58] sm:$0xff]  ;;  %v1055_v26 = vmov 0  }
  0x74   :  { %814 = vmatpush3.bf16.msra.mxu1 %v813_v12  ;;  %v798_v31 = vpack.c.bf16 %v123_v29, %v122_v28  ;;  %v124_v34 = vld [vmem:[#allocation12 + $0x50] sm:$0xff]  ;;  %v125_v35 = vld [vmem:[#allocation12 + $0x58] sm:$0xff]  ;;  %v825_v36 = vpack.c.bf16 %v224_v33, %v223_v32  ;;  %v225_v38 = vld [vmem:[#allocation14 + $0x60] sm:$0xff]  ;;  %871 = vset.pattern.permute.xlu0 %v1055_v26 }
  0x75   :  { %790 = vmatpush3.bf16.msra.mxu0 %v789_v13  ;;  %815 = vmatprep.subr.bf16.mxu1 %v1051_v0  ;;  %v801_v37 = vpack.c.bf16 %v125_v35, %v124_v34  ;;  %v226_v39 = vld [vmem:[#allocation14 + $0x68] sm:$0xff]  ;;  %v126_v40 = vld [vmem:[#allocation12 + $0x60] sm:$0xff]  ;;  %v227_v44 = vld [vmem:[#allocation14 + $0x70] sm:$0xff] }
  0x76   :  { %791 = vmatprep.subr.bf16.mxu0 %v1051_v0  ;;  %v127_v41 = vld [vmem:[#allocation12 + $0x68] sm:$0xff]  ;;  %v828_v42 = vpack.c.bf16 %v226_v39, %v225_v38  ;;  %v228_v45 = vld [vmem:[#allocation14 + $0x78] sm:$0xff]  ;;  %v128_v46 = vld [vmem:[#allocation12 + $0x70] sm:$0xff]  ;;  %872 = vset.pattern.permute.xlu1 %v1055_v26 }
  0x77   :  { %v804_v43 = vpack.c.bf16 %v127_v41, %v126_v40  ;;  %v129_v47 = vld [vmem:[#allocation12 + $0x78] sm:$0xff]  ;;  %v831_v48 = vpack.c.bf16 %v228_v45, %v227_v44  ;;  %v212_v50 = vld [vmem:[#allocation9] sm:$0xff]  ;;  %v113_v51 = vld [vmem:[#allocation6] sm:$0xff] }
  0x78   :  { %817 = vmatpush3.bf16.msra.mxu1 %v816_v18  ;;  %v807_v49 = vpack.c.bf16 %v129_v47, %v128_v46  ;;  %v612_v52 = vld [vmem:[%s1273_s6] ss:$0 sm:$0xff]  ;;  %v307_v60 = vld [vmem:[#allocation15] sm:$0xff]  ;;  %v308_v61 = vld [vmem:[#allocation15 + $0x8] sm:$0xff] }
  0x79   :  { %793 = vmatpush3.bf16.msra.mxu0 %v792_v19  ;;  %818 = vmatprep.subr.bf16.mxu1 %v1051_v0  ;;  %v611_v53 = vld [vmem:[%s1271_s4] ss:$0 sm:$0xff]  ;;  %v309_v62 = vld [vmem:[#allocation15 + $0x10] sm:$0xff]  ;;  %v834_v63 = vpack.c.bf16 %v308_v61, %v307_v60  ;;  %v311_v5 = vld [vmem:[#allocation15 + $0x20] sm:$0xff] }
  0x7a   :  { %794 = vmatprep.subr.bf16.mxu0 %v1051_v0  ;;  %v310_v2 = vld [vmem:[#allocation15 + $0x18] sm:$0xff]  ;;  %v312_v6 = vld [vmem:[#allocation15 + $0x28] sm:$0xff]  ;;  %v313_v8 = vld [vmem:[#allocation15 + $0x30] sm:$0xff] }
  0x7b   :  { %v837_v4 = vpack.c.bf16 %v310_v2, %v309_v62  ;;  %v840_v7 = vpack.c.bf16 %v312_v6, %v311_v5  ;;  %v314_v9 = vld [vmem:[#allocation15 + $0x38] sm:$0xff]  ;;  %v315_v11 = vld [vmem:[#allocation15 + $0x40] sm:$0xff]  ;;  %v316_v12 = vld [vmem:[#allocation15 + $0x48] sm:$0xff] }
  0x7c   :  { %820 = vmatpush3.bf16.msra.mxu1 %v819_v24  ;;  %v843_v10 = vpack.c.bf16 %v314_v9, %v313_v8  ;;  %v317_v13 = vld [vmem:[#allocation15 + $0x50] sm:$0xff]  ;;  %v318_v14 = vld [vmem:[#allocation15 + $0x58] sm:$0xff]  ;;  %v319_v16 = vld [vmem:[#allocation15 + $0x60] sm:$0xff] }
  0x7d   :  { %796 = vmatpush3.bf16.msra.mxu0 %v795_v25  ;;  %821 = vmatprep.subr.bf16.mxu1 %v1051_v0  ;;  %v849_v15 = vpack.c.bf16 %v318_v14, %v317_v13  ;;  %v320_v17 = vld [vmem:[#allocation15 + $0x68] sm:$0xff]  ;;  %v321_v19 = vld [vmem:[#allocation15 + $0x70] sm:$0xff]  ;;  %v322_v20 = vld [vmem:[#allocation15 + $0x78] sm:$0xff] }
  0x7e   :  { %797 = vmatprep.subr.bf16.mxu0 %v1051_v0  ;;  %v852_v18 = vpack.c.bf16 %v320_v17, %v319_v16  ;;  %v855_v21 = vpack.c.bf16 %v322_v20, %v321_v19  ;;  %v306_v22 = vld [vmem:[#allocation11] sm:$0xff]  ;;  %v488_v41 = vld [vmem:[#allocation4] sm:$0xff] }
  0x7f   :  { %v471_v27 = vld [vmem:[#allocation3] sm:$0xff] }
  0x80   :  { %823 = vmatpush3.bf16.msra.mxu1 %v822_v30 }
  0x81   :  { %799 = vmatpush3.bf16.msra.mxu0 %v798_v31  ;;  %824 = vmatprep.subr.bf16.mxu1 %v1051_v0 }
  0x82   :  { %800 = vmatprep.subr.bf16.mxu0 %v1051_v0 }
  0x84   :  { %826 = vmatpush3.bf16.msra.mxu1 %v825_v36 }
  0x85   :  { %802 = vmatpush3.bf16.msra.mxu0 %v801_v37  ;;  %827 = vmatprep.subr.bf16.mxu1 %v1051_v0 }
  0x86   :  { %803 = vmatprep.subr.bf16.mxu0 %v1051_v0 }
  0x88   :  { %829 = vmatpush3.bf16.msra.mxu1 %v828_v42 }
  0x89   :  { %805 = vmatpush3.bf16.msra.mxu0 %v804_v43  ;;  %830 = vmatprep.subr.bf16.mxu1 %v1051_v0 }
  0x8a   :  { %806 = vmatprep.subr.bf16.mxu0 %v1051_v0 }
  0x8c   :  { %832 = vmatpush3.bf16.msra.mxu1 %v831_v48 }
  0x8d   :  { %808 = vmatpush3.bf16.msra.mxu0 %v807_v49  ;;  %775 = vmatprep.subr.mxu1 %v1053_v1 }
  0x8e   :  { %833 = vmatprep.subr.bf16.mxu0 %v1051_v0 }
  0x8f   :  { %738 = vmatmul.mubr.f32.vlgmr.msra.gmra.mrb[0].mxu1 %v212_v50 }
  0x90   :  { %703 = vmatmul.mubr.f32.vlgmr.msra.gmra.mrb[0].mxu0 %v113_v51  ;;  %777 = vmatprep.mubr.msk.f32.mxu1 %vm1052_vm0, %v1053_v1 }
  0x91   :  { %772 = vmatprep.mubr.msk.f32.mxu0 %vm1052_vm0, %v1053_v1  ;;  %835 = vmatpush3.bf16.msra.mxu0 %v834_v63 }
  0x92   :  { %836 = vmatprep.subr.bf16.mxu0 %v1051_v0 }
  0x95   :  { %838 = vmatpush3.bf16.msra.mxu0 %v837_v4 }
  0x96   :  { %839 = vmatprep.subr.bf16.mxu0 %v1051_v0 }
  0x99   :  { %841 = vmatpush3.bf16.msra.mxu0 %v840_v7 }
  0x9a   :  { %842 = vmatprep.subr.bf16.mxu0 %v1051_v0 }
  0x9d   :  { %844 = vmatpush3.bf16.msra.mxu0 %v843_v10 }
  0x9e   :  { %845 = vmatprep.subr.bf16.mxu0 %v1051_v0 }
 0x162   :  { %v302_v54 = vpop.f32.mrb[0].mxu1 }
 0x163   :  { %v303_v55 = vadd.f32 %v612_v52, %v302_v54  ;;  %v739_v56 = vpop.f32.mrb[1].mxu1  ;;  %v203_v57 = vpop.f32.mrb[0].mxu0 }
 0x164   :  { %v204_v58 = vadd.f32 %v611_v53, %v203_v57  ;;  %v704_v59 = vpop.f32.mrb[1].mxu0 }
 0x165   :  { %776 = vmatpush3.xpose.msra.mxu1 %v303_v55 }
 0x166   :  { %780 = vmatprep.subr.mxu1 %v1053_v1 }
 0x168   :  { %778 = vmatmul.mubr.f32.vlgmr.msra.gmra.mrb[2].mxu1 %v204_v58 }
 0x169   :  { %782 = vmatprep.mubr.msk.f32.mxu1 %vm1052_vm0, %v1053_v1  ;;  %v846_v1 = vpack.c.bf16 %v316_v12, %v315_v11 }
 0x16b   :  { %847 = vmatpush3.bf16.msra.mxu0 %v846_v1 }
 0x16c   :  { %848 = vmatprep.subr.bf16.mxu0 %v1051_v0 }
 0x16f   :  { %850 = vmatpush3.bf16.msra.mxu0 %v849_v15 }
 0x170   :  { %851 = vmatprep.subr.bf16.mxu0 %v1051_v0 }
 0x173   :  { %853 = vmatpush3.bf16.msra.mxu0 %v852_v18 }
 0x174   :  { %854 = vmatprep.subr.bf16.mxu0 %v1051_v0  ;;  %v613_v0 = vld [vmem:[%s1275_s8] ss:$0 sm:$0xff]  ;;  %s1056_s8 = smov [#allocation17]  }
 0x175   :  { %s599_s18 = sshll.u32 %s1056_s8, 4  ;;  %s600_s18 = int_to_ptr.vmem [resolvable:$true] %s599_s18 }
 0x176   :  { %s1011_s19 = scalar_lea.vmem %s600_s18, 128  ;;  %p1016_p7 = scmp.lt.s32.totalorder %s600_s18, %s600_s18 }
 0x177   :  { %856 = vmatpush3.bf16.msra.mxu0 %v855_v21  ;;  %p1012_p6 = scmp.ne.s32.totalorder %s600_s18, %s1011_s19  ;;  %p1017_p8 = scmp.lt.s32.totalorder %s1011_s19, %s1011_s19 }
 0x179   :  { %p1018_p9 = por %p1017_p8, %p1016_p7 }
 0x17a   :  { %773 = vmatmul.mubr.f32.vlgmr.msra.gmra.mrb[2].mxu0 %v306_v22 }
 0x17b   :  { %p1019_p10 = pnand %p1018_p9, %p1012_p6 }
 0x23b   :  { %v467_v23 = vpop.f32.mrb[2].mxu1 }
 0x23c   :  { %v779_v24 = vpop.f32.mrb[3].mxu1  ;;  %v473_v25 = vsel %vm472_vm2, %v467_v23, -inf }
 0x23d   :  { %474 = vmax.xlane.f32.xlu0 %v473_v25 }
 0x24d   :  { %v396_v31 = vpop.f32.mrb[2].mxu0 }
 0x24e   :  { %v397_v32 = vadd.f32 %v613_v0, %v396_v31  ;;  %v774_v33 = vpop.f32.mrb[3].mxu0 }
 0x250   :  { %781 = vmatpush3.msra.mxu1 %v397_v32 }
 0x2ca   :  { %v475_v28 = vpop.xlane.xlu0 %474 }
 0x2cb   :  { %v476_v29 = vmax.f32 %v471_v27, %v475_v28 }
 0x2cd   :  { %v477_v30 = vsub.f32 %v471_v27, %v476_v29  ;;  %578 = vst.msk [vmem:[#allocation3] sm:$0xff] %vm208_vm1, %v476_v29  ;;  %482 = vperm.xlu0 %871, %v476_v29  }
 0x2cf   :  { %v478_v39 = vmul.f32 1.442695, %v477_v30 }
 0x34c   :  { %v483_v34 = vpop.permute.xlu0 %482 }
 0x34d   :  { %v485_v35 = vsub.f32 %v467_v23, %v483_v34 }
 0x34f   :  { %v486_v36 = vmul.f32 1.442695, %v485_v35 }
 0x351   :  { %873 = vpow2.f32 %v486_v36 }
 0x352   :  { %875 = vpow2.f32 %v478_v39 }
 0x35b   :  { %v874_v37 = vpop.eup %873 }
 0x35c   :  { %783 = vmatmul.mubr.msk.f32.vlgmr.msra.gmra.mrb[4].mxu1 %vm472_vm2, %v874_v37  ;;  %v490_v38 = vsel %vm472_vm2, %v874_v37, 0.0  ;;  %v876_v40 = vpop.eup %875 }
 0x35d   :  { %491 = vadd.xlane.f32.xlu1 %v490_v38  ;;  %v489_v42 = vmul.f32 %v876_v40, %v488_v41 }
 0x36e   :  { %499 = vperm.xlu1 %872, %v876_v40  }
 0x3ea   :  { %v492_v43 = vpop.xlane.xlu1 %491 }
 0x3eb   :  { %v493_v44 = vadd.f32 %v492_v43, %v489_v42 }
 0x3ed   :  { %495 = vst.msk [vmem:[#allocation4] sm:$0xff] %vm208_vm1, %v493_v44 }
 0x3ee   :  { %v500_v50 = vpop.permute.xlu1 %499 }
 0x3ef   :  { %v502_v51 = vmul.f32 0.0, %v500_v50 }
 0x3f4   :  { %v582_v45 = vld [vmem:[#allocation4] sm:$0xff] }
 0x3f5   :  { %877 = vrcp.f32 %v582_v45 }
 0x3ff   :  { %v878_v46 = vpop.eup %877 }
 0x400   :  { %v584_v47 = vmul.f32 0.25, %v878_v46 }
 0x402   :  { %588 = vperm.xlu1 %872, %v584_v47  }
 0x42f   :  { %v572_v48 = vpop.f32.mrb[4].mxu1 }
 0x430   :  { %v784_v49 = vpop.f32.mrb[5].mxu1  ;;  %v576_v52 = vadd.f32 %v572_v48, %v502_v51 }
 0x481   :  { %v589_v53 = vpop.permute.xlu1 %588 }
 0x482   :  { %v591_v54 = vmul.f32 %v589_v53, %v576_v52 }
 0x484   :  { %592 = vst [vmem:[#allocation17] sm:$0xff] %v591_v54 }
 0x485   :  { %1022 = shalt.err (!%p1019_p10)
}
 0x486   :  { %s1023_s22 = scalar_lea.hbm %s1276_s9, 128 }
 0x487   :  { %p1024_p11 = scmp.ne.s32.totalorder %s1276_s9, %s1023_s22  ;;  %p1027_p12 = scmp.lt.u32.totalorder %s1023_s22, %s1276_s9 }
 0x489   :  { %p1029_p13 = pnand %p1027_p12, %p1024_p11 }
 0x48b   :  { %1032 = shalt.err (!%p1029_p13)
}
 0x48c   :  { %602 = dma.vmem_to_hbm [thread:$0]  %s600_s18, 128, %s1276_s9, [#allocation8]  }
 0x48d   :  { %1041 = dma.done.wait [#allocation8], 128  }
 0x48e   :  { %1042 = vsyncadd [#allocation8], 4294967168 }
 0x48f   :  { %606 = vsyncpa [#allocation7], 1 }
 0x490   :  { %607 = vsyncpa [#allocation10], 1 }
 0x491   :  { %608 = vsyncpa [#allocation13], 1 }
 0x492   :  { %609 = vsyncpa [#allocation16], 1 }
 0x493   :  { %610 = vsyncpa [#allocation8], 1 }

</bundles_post_ra>
